<compile_context>
chip_gen: v6e
topology: v6e:2x2x1
jax: 0.10.0
libtpu: 0.0.40
codegen_flags: <defaults>
</compile_context>

<pallas_src>
import functools
import numpy as np
import jax
import jax.numpy as jnp
from jax.experimental import pallas as pl
from jax.experimental.pallas import tpu as pltpu

# -------- small configuration consistent with DocREModel ---------------------------------
HIDDEN   = 64     # config.hidden_size
NUM_LAB  = 4      # config.num_labels
HEADS    = 4      # attention heads
SEQ_LEN  = 32     # sequence length
NE       = 8      # args.max_height (min_height)
FEAT_DIM = 256    # self.featureDim (hard-coded in module)
REL_DIM  = 256    # self.relation_dim (hard-coded in module)
SEG_MID  = 16     # stand-in SegNet hidden channels


# ================================= Pallas kernels ========================================

def mention_pool_kernel(e_ref, mask_ref, grp_ref, w_ref, b_ref, anet_t_ref, o_ref,
                        *, num_labels):
    """Batched mention-attention pooling for ALL bs*ne entities in one invocation.
    e_ref:(R,d) flat mention embeddings (R = bs*ne*nm), mask_ref:(R,1) additive mask,
    grp_ref:(G,R) 0/1 entity-membership matrix, w_ref:(d,REL), b_ref:(1,REL),
    anet_t_ref:(REL,K), o_ref:(K,G,d)."""
    E = e_ref[...]                                                     # (R, d) f32
    s = jnp.tanh(jnp.dot(E, w_ref[...], preferred_element_type=jnp.float32) + b_ref[...])
    s = jnp.dot(s, anet_t_ref[...], preferred_element_type=jnp.float32) + mask_ref[...]
    # global constant shift keeps every per-entity softmax identical but overflow-safe
    m = jnp.max(s, axis=0, keepdims=True)
    m = jnp.max(m, axis=1, keepdims=True)                              # (1, 1)
    p = jnp.exp(s - m)                                                 # masked rows -> 0
    A = grp_ref[...]                                                   # (G, R)
    denom = jnp.dot(A, p, preferred_element_type=jnp.float32)          # (G, K)
    inv = 1.0 / jnp.maximum(denom, 1e-30)                              # padded entities -> 0
    for k in range(num_labels):
        numer = jnp.dot(A, p[:, k:k + 1] * E, preferred_element_type=jnp.float32)  # (G, d)
        o_ref[k] = numer * inv[:, k:k + 1]


def fused_map_kernel(a_ref, seq_ref, sh_ref, w1_ref, b1_ref, w2_ref, b2_ref, o_ref,
                     *, ne, heads):
    """Per batch element: context-based channel map + (Linear folded into conv1) +
    two 3x3 'same' convs, fully VMEM-resident.
    a_ref:(1,ne,H,L)  seq_ref:(1,L,d) bf16  sh_ref:(9,ne*ne,ne*ne) shift mats
    w1_ref:(9*d,SEG_MID) bf16  b1_ref:(ne*ne,SEG_MID)  w2_ref:(9*SEG_MID,F) bf16
    b2_ref:(1,F)  o_ref:(1,ne*ne,F)."""
    L = a_ref.shape[-1]
    a = a_ref[0]                                                       # (ne, heads, L)
    acc = jnp.zeros((ne, ne, L), dtype=jnp.float32)
    for h in range(heads):                                             # mean over heads of h*t
        ah = a[:, h, :]                                                # (ne, L)
        acc = acc + ah[:, None, :] * ah[None, :, :]
    acc = acc * (1.0 / heads)
    denom = jnp.sum(acc, axis=-1, keepdims=True) + 1e-5
    ht_att = (acc / denom).reshape(ne * ne, L)                         # (ne*ne, L)
    rs = jnp.dot(ht_att.astype(jnp.bfloat16), seq_ref[0],
                 preferred_element_type=jnp.float32)                   # (ne*ne, d)

    # conv1 (Linear(hidden->3) folded into its weights); zero-padding via shift matrices,
    # im2col patches -> single large-contraction matmul.
    patches = jnp.concatenate(
        [jnp.dot(sh_ref[t], rs, preferred_element_type=jnp.float32) for t in range(9)],
        axis=-1)                                                       # (ne*ne, 9*d)
    h1 = jnp.dot(patches.astype(jnp.bfloat16), w1_ref[...],
                 preferred_element_type=jnp.float32) + b1_ref[...]
    h1 = jnp.maximum(h1, 0.0)                                          # (ne*ne, SEG_MID)

    # conv2
    patches2 = jnp.concatenate(
        [jnp.dot(sh_ref[t], h1, preferred_element_type=jnp.float32) for t in range(9)],
        axis=-1)                                                       # (ne*ne, 9*SEG_MID)
    o_ref[0] = jnp.dot(patches2.astype(jnp.bfloat16), w2_ref[...],
                       preferred_element_type=jnp.float32) + b2_ref[...]


def pair_classifier_kernel(hs_ref, ts_ref, ht_ref,
                           whx_ref, whf_ref, bh_ref,
                           wtx_ref, wtf_ref, bt_ref,
                           bil_ref, bilb_ref,
                           logits_ref, pred_ref, *, num_labels):
    """Head/tail extractors (+tanh) + einsum('nkd,kdp,nkp->nk') bilinear + get_label,
    tiled over pair blocks.  hs/ts:(TN,K,H) bf16, ht:(TN,F) bf16, outputs (TN,K) f32."""
    ht = ht_ref[...]
    # concat([x, ht]) @ W.T  ==  x @ Wx + ht @ Wf   (weights pre-split in the wrapper)
    ht_h = jnp.dot(ht, whf_ref[...], preferred_element_type=jnp.float32) + bh_ref[...]
    ht_t = jnp.dot(ht, wtf_ref[...], preferred_element_type=jnp.float32) + bt_ref[...]
    hss = hs_ref[...]
    tss = ts_ref[...]
    bilb = bilb_ref[...]
    cols = []
    for k in range(num_labels):
        hk = jnp.tanh(jnp.dot(hss[:, k, :], whx_ref[...],
                              preferred_element_type=jnp.float32) + ht_h)
        tk = jnp.tanh(jnp.dot(tss[:, k, :], wtx_ref[...],
                              preferred_element_type=jnp.float32) + ht_t)
        tmp = jnp.dot(hk.astype(jnp.bfloat16), bil_ref[k],
                      preferred_element_type=jnp.float32)
        col = jnp.sum(tmp * tk, axis=-1, keepdims=True) + bilb[0, k]   # (TN, 1)
        cols.append(col)
    logits_ref[...] = jnp.concatenate(cols, axis=-1)                   # single (TN, K) store
    # NCRLoss.get_label: threshold class 0, num_labels=-1 => no top-k
    th = cols[0]
    pos = [(cols[k] > th).astype(jnp.float32) for k in range(1, num_labels)]
    pos_sum = pos[0]
    for p in pos[1:]:
        pos_sum = pos_sum + p
    pred_cols = [(pos_sum == 0.0).astype(jnp.float32)] + pos
    pred_ref[...] = jnp.concatenate(pred_cols, axis=-1)                # single (TN, K) store


# ================================= wrappers ===============================================

def _make_shift_mats(ne):
    """(9, ne*ne, ne*ne) 0/1 matrices realizing a 3x3 'same' zero-padded spatial shift."""
    mats = np.zeros((9, ne * ne, ne * ne), np.float32)
    t = 0
    for ky in range(3):
        for kx in range(3):
            dy, dx = ky - 1, kx - 1
            for y in range(ne):
                for x in range(ne):
                    yy, xx = y + dy, x + dx
                    if 0 <= yy < ne and 0 <= xx < ne:
                        mats[t, y * ne + x, yy * ne + xx] = 1.0
            t += 1
    return mats


def init_params(key):
    ks = jax.random.split(key, 16)
    u = lambda k, shape, b: jax.random.uniform(k, shape, jnp.float32, -b, b)
    p = {}
    bl = 1.0 / np.sqrt(HIDDEN)
    p['w_lin'] = u(ks[0], (HIDDEN, 3), bl)                    # self.linear (transposed)
    p['b_lin'] = u(ks[1], (1, 3), bl)
    p['w_attn'] = u(ks[2], (HIDDEN, REL_DIM), bl)             # attention_weight (transposed)
    p['b_attn'] = u(ks[3], (1, REL_DIM), bl)
    xav = np.sqrt(2.0 / (NUM_LAB + REL_DIM))
    p['attention_net_T'] = jax.random.normal(ks[4], (REL_DIM, NUM_LAB), jnp.float32) * xav
    be = 1.0 / np.sqrt(HIDDEN + FEAT_DIM)
    p['w_head_x'] = u(ks[5], (HIDDEN, HIDDEN), be)            # head_extractor, split
    p['w_head_f'] = u(ks[6], (FEAT_DIM, HIDDEN), be)
    p['b_head'] = u(ks[7], (1, HIDDEN), be)
    p['w_tail_x'] = u(ks[8], (HIDDEN, HIDDEN), be)            # tail_extractor, split
    p['w_tail_f'] = u(ks[9], (FEAT_DIM, HIDDEN), be)
    p['b_tail'] = u(ks[10], (1, HIDDEN), be)
    bb = np.sqrt(1.0 / (2 * HIDDEN))
    p['bilinear'] = u(ks[11], (NUM_LAB, HIDDEN, HIDDEN), bb)
    p['bilinear_bias'] = u(ks[12], (1, NUM_LAB), bb)
    p['conv1_w'] = jax.random.normal(ks[13], (3, 3, 3, SEG_MID), jnp.float32) * 0.1
    p['conv1_b'] = jnp.zeros((1, SEG_MID), jnp.float32)
    p['conv2_w'] = jax.random.normal(ks[14], (3, 3, SEG_MID, FEAT_DIM), jnp.float32) * 0.1
    p['conv2_b'] = jnp.zeros((1, FEAT_DIM), jnp.float32)
    return p


def docre_forward(params, sequence_output, attention, entity_pos, hts):
    bs, L, d = sequence_output.shape
    H = attention.shape[1]
    ne = NE
    nm = max(max(len(m) for m in doc) for doc in entity_pos)
    offset = 1  # bert

    # ---- glue: gather mention embeddings / attentions (mirrors get_entity_embs_and_attn) ----
    tok = np.zeros((bs, ne, nm), np.int32)
    listed = np.zeros((bs, ne, nm), np.float32)
    counts = np.ones((bs, ne), np.float32)
    for b, doc in enumerate(entity_pos):
        for e, ment in enumerate(doc):
            counts[b, e] = max(len(ment), 1)
            for m, (start, _end, _sid) in enumerate(ment):
                tok[b, e, m] = start + offset
                listed[b, e, m] = 1.0
    tok_j = jnp.asarray(np.clip(tok, 0, L - 1))
    valid = jnp.asarray((tok < L).astype(np.float32) * listed)            # (bs, ne, nm)
    b_idx = jnp.asarray(np.broadcast_to(np.arange(bs)[:, None, None],
                                        (bs, ne, nm)).astype(np.int32))

    ment_emb = sequence_output[b_idx, tok_j] * valid[..., None]           # (bs, ne, nm, d)
    ment_att = attention[b_idx, :, tok_j] * valid[..., None, None]        # (bs, ne, nm, H, L)
    entity_as = jnp.sum(ment_att, axis=2) / jnp.asarray(counts)[..., None, None]  # (bs,ne,H,L)
    men_mask = (1.0 - jnp.asarray(listed)) * -1e6                         # (bs, ne, nm)

    # ---- kernel 1: batched mention attention pooling -> entity_embs (bs, ne, K, d) ----
    G = bs * ne
    R = G * nm
    e2 = ment_emb.reshape(R, d)
    mask2 = men_mask.reshape(R, 1)
    grp_np = np.zeros((G, R), np.float32)
    for g in range(G):
        grp_np[g, g * nm:(g + 1) * nm] = 1.0
    grp = jnp.asarray(grp_np)

    pooled_kgd = pl.pallas_call(
        functools.partial(mention_pool_kernel, num_labels=NUM_LAB),
        out_shape=jax.ShapeDtypeStruct((NUM_LAB, G, d), jnp.float32),
    )(e2, mask2, grp, params['w_attn'], params['b_attn'], params['attention_net_T'])
    entity_embs = jnp.transpose(pooled_kgd, (1, 0, 2)).reshape(bs, ne, NUM_LAB, d)

    # ---- kernel 2: fused channel map + Linear(->3) + SegNet stand-in (two 3x3 convs) ----
    # fold Linear(hidden->3) into conv1; per-pixel bias map keeps zero-padded borders exact
    w_lin, b_lin = params['w_lin'], params['b_lin']
    conv1_w, conv1_b = params['conv1_w'], params['conv1_b']
    conv2_w, conv2_b = params['conv2_w'], params['conv2_b']
    w1_folded = jnp.einsum('dc,yxcm->yxdm', w_lin, conv1_w)               # (3,3,d,SEG_MID)
    w1_flat = w1_folded.reshape(9 * d, SEG_MID).astype(jnp.bfloat16)
    w2_flat = conv2_w.reshape(9 * SEG_MID, FEAT_DIM).astype(jnp.bfloat16)
    bmap = jnp.broadcast_to(b_lin.reshape(1, 1, 3), (ne, ne, 3))
    bpad = jnp.pad(bmap, ((1, 1), (1, 1), (0, 0)))
    b1 = jnp.zeros((ne, ne, SEG_MID), jnp.float32)
    for ky in range(3):
        for kx in range(3):
            b1 = b1 + jnp.einsum('yxc,cm->yxm', bpad[ky:ky + ne, kx:kx + ne, :],
                                 conv1_w[ky, kx])
    b1 = (b1 + conv1_b.reshape(1, 1, SEG_MID)).reshape(ne * ne, SEG_MID)

    sh = jnp.asarray(_make_shift_mats(ne))                                # (9, ne*ne, ne*ne)
    seq_bf16 = sequence_output.astype(jnp.bfloat16)

    attn_map_flat = pl.pallas_call(
        functools.partial(fused_map_kernel, ne=ne, heads=H),
        out_shape=jax.ShapeDtypeStruct((bs, ne * ne, FEAT_DIM), jnp.float32),
        grid=(bs,),
        in_specs=[
            pl.BlockSpec((1, ne, H, L), lambda b: (b, 0, 0, 0)),
            pl.BlockSpec((1, L, d), lambda b: (b, 0, 0)),
            pl.BlockSpec((9, ne * ne, ne * ne), lambda b: (0, 0, 0)),
            pl.BlockSpec((9 * d, SEG_MID), lambda b: (0, 0)),
            pl.BlockSpec((ne * ne, SEG_MID), lambda b: (0, 0)),
            pl.BlockSpec((9 * SEG_MID, FEAT_DIM), lambda b: (0, 0)),
            pl.BlockSpec((1, FEAT_DIM), lambda b: (0, 0)),
        ],
        out_specs=pl.BlockSpec((1, ne * ne, FEAT_DIM), lambda b: (b, 0, 0)),
        compiler_params=pltpu.CompilerParams(
            dimension_semantics=("parallel",),
            vmem_limit_bytes=32 * 1024 * 1024),
    )(entity_as, seq_bf16, sh, w1_flat, b1, w2_flat, conv2_b)
    attn_map = attn_map_flat.reshape(bs, ne, ne, FEAT_DIM)                # NHWC

    # ---- glue: get_hts gathering (N-major, d on lanes; no (K,N,d) transpose) ----
    bi, hi, ti = [], [], []
    for b, pairs in enumerate(hts):
        for (h_index, t_index) in pairs:
            bi.append(b); hi.append(h_index); ti.append(t_index)
    bi = jnp.asarray(np.asarray(bi, np.int32))
    hi = jnp.asarray(np.asarray(hi, np.int32))
    ti = jnp.asarray(np.asarray(ti, np.int32))
    hss = entity_embs[bi, hi]          # (N, K, d)
    tss = entity_embs[bi, ti]          # (N, K, d)
    htss = attn_map[bi, hi, ti]        # (N, FEAT)
    N = hss.shape[0]

    TN = 128
    n_pad = (-N) % TN
    N_pad = N + n_pad
    bf = jnp.bfloat16
    hss_p = jnp.pad(hss, ((0, n_pad), (0, 0), (0, 0))).astype(bf)
    tss_p = jnp.pad(tss, ((0, n_pad), (0, 0), (0, 0))).astype(bf)
    htss_p = jnp.pad(htss, ((0, n_pad), (0, 0))).astype(bf)

    # ---- kernel 3: extractors + bilinear logits + pred (tiled over pair blocks) ----
    logits_p, pred_p = pl.pallas_call(
        functools.partial(pair_classifier_kernel, num_labels=NUM_LAB),
        out_shape=(jax.ShapeDtypeStruct((N_pad, NUM_LAB), jnp.float32),
                   jax.ShapeDtypeStruct((N_pad, NUM_LAB), jnp.float32)),
        grid=(N_pad // TN,),
        in_specs=[
            pl.BlockSpec((TN, NUM_LAB, d), lambda i: (i, 0, 0)),
            pl.BlockSpec((TN, NUM_LAB, d), lambda i: (i, 0, 0)),
            pl.BlockSpec((TN, FEAT_DIM), lambda i: (i, 0)),
            pl.BlockSpec((d, d), lambda i: (0, 0)),
            pl.BlockSpec((FEAT_DIM, d), lambda i: (0, 0)),
            pl.BlockSpec((1, d), lambda i: (0, 0)),
            pl.BlockSpec((d, d), lambda i: (0, 0)),
            pl.BlockSpec((FEAT_DIM, d), lambda i: (0, 0)),
            pl.BlockSpec((1, d), lambda i: (0, 0)),
            pl.BlockSpec((NUM_LAB, d, d), lambda i: (0, 0, 0)),
            pl.BlockSpec((1, NUM_LAB), lambda i: (0, 0)),
        ],
        out_specs=(pl.BlockSpec((TN, NUM_LAB), lambda i: (i, 0)),
                   pl.BlockSpec((TN, NUM_LAB), lambda i: (i, 0))),
        compiler_params=pltpu.CompilerParams(
            dimension_semantics=("parallel",),
            vmem_limit_bytes=32 * 1024 * 1024),
    )(hss_p, tss_p, htss_p,
      params['w_head_x'].astype(bf), params['w_head_f'].astype(bf), params['b_head'],
      params['w_tail_x'].astype(bf), params['w_tail_f'].astype(bf), params['b_tail'],
      params['bilinear'].astype(bf), params['bilinear_bias'])

    logits = logits_p[:N]              # (N, K)
    pred = pred_p[:N]                  # (N, K)
    return {'pred': pred, 'logits': logits}


if __name__ == "__main__":
    key = jax.random.PRNGKey(0)
    k_param, k_seq, k_att = jax.random.split(key, 3)
    params = init_params(k_param)

    bs = 2
    sequence_output = jax.random.normal(k_seq, (bs, SEQ_LEN, HIDDEN), jnp.float32)
    attention = jax.nn.softmax(
        jax.random.normal(k_att, (bs, HEADS, SEQ_LEN, SEQ_LEN), jnp.float32), axis=-1)

    entity_pos = [
        [[(2, 3, 0), (10, 11, 0)], [(5, 6, 0)], [(14, 15, 1)],
         [(20, 21, 1), (25, 26, 1)], [(7, 8, 0)]],
        [[(1, 2, 0)], [(3, 4, 0), (18, 19, 1)], [(6, 7, 0)], [(9, 10, 0)],
         [(12, 13, 1)], [(16, 17, 1)], [(22, 23, 1), (28, 29, 1)], [(26, 27, 1)]],
    ]
    hts = []
    for doc in entity_pos:
        n = len(doc)
        hts.append([(h, t) for h in range(n) for t in range(n) if h != t])

    out = docre_forward(params, sequence_output, attention, entity_pos, hts)
    jax.block_until_ready(out['pred'])
    jax.block_until_ready(out['logits'])
    print("KERNEL_OK")
</pallas_src>

<mosaic_0001>
module attributes {stable_mosaic.version = 11 : i64} {
  func.func @mention_pool_kernel(%arg0: memref<32x64xf32, #tpu.memory_space<vmem>>, %arg1: memref<32x1xf32, #tpu.memory_space<vmem>>, %arg2: memref<16x32xf32, #tpu.memory_space<vmem>>, %arg3: memref<64x256xf32, #tpu.memory_space<vmem>>, %arg4: memref<1x256xf32, #tpu.memory_space<vmem>>, %arg5: memref<256x4xf32, #tpu.memory_space<vmem>>, %arg6: memref<4x16x64xf32, #tpu.memory_space<vmem>>) attributes {dimension_semantics = [], scalar_prefetch = 0 : i64, scratch_operands = 0 : i64, tpu.core_type = #tpu.core_type<tc>} {
    %c0 = arith.constant 0 : index
    %c0_0 = arith.constant 0 : index
    %0 = vector.load %arg0[%c0, %c0_0] : memref<32x64xf32, #tpu.memory_space<vmem>>, vector<32x64xf32>
    %c0_1 = arith.constant 0 : index
    %c0_2 = arith.constant 0 : index
    %1 = vector.load %arg3[%c0_1, %c0_2] : memref<64x256xf32, #tpu.memory_space<vmem>>, vector<64x256xf32>
    %cst = arith.constant dense<0.000000e+00> : vector<32x256xf32>
    %2 = tpu.matmul %0, %1, %cst {dimension_numbers = #tpu.dot_dimension_numbers<[1], [0], [0], [1], [0, 0, 1, 1], [], []>} : vector<32x64xf32>, vector<64x256xf32>, vector<32x256xf32> -> vector<32x256xf32>
    %c0_3 = arith.constant 0 : index
    %c0_4 = arith.constant 0 : index
    %3 = vector.load %arg4[%c0_3, %c0_4] : memref<1x256xf32, #tpu.memory_space<vmem>>, vector<1x256xf32>
    %4 = vector.broadcast %3 : vector<1x256xf32> to vector<32x256xf32>
    %5 = arith.addf %2, %4 : vector<32x256xf32>
    %6 = math.tanh %5 : vector<32x256xf32>
    %c0_5 = arith.constant 0 : index
    %c0_6 = arith.constant 0 : index
    %7 = vector.load %arg5[%c0_5, %c0_6] : memref<256x4xf32, #tpu.memory_space<vmem>>, vector<256x4xf32>
    %cst_7 = arith.constant dense<0.000000e+00> : vector<32x4xf32>
    %8 = tpu.matmul %6, %7, %cst_7 {dimension_numbers = #tpu.dot_dimension_numbers<[1], [0], [0], [1], [0, 0, 1, 1], [], []>} : vector<32x256xf32>, vector<256x4xf32>, vector<32x4xf32> -> vector<32x4xf32>
    %c0_8 = arith.constant 0 : index
    %c0_9 = arith.constant 0 : index
    %9 = vector.load %arg1[%c0_8, %c0_9] : memref<32x1xf32, #tpu.memory_space<vmem>>, vector<32x1xf32>
    %10 = vector.broadcast %9 : vector<32x1xf32> to vector<32x4xf32>
    %11 = arith.addf %8, %10 : vector<32x4xf32>
    %cst_10 = arith.constant dense<0xFF800000> : vector<4xf32>
    %12 = vector.multi_reduction <maximumf>, %11, %cst_10 [0] : vector<32x4xf32> to vector<4xf32>
    %13 = vector.shape_cast %12 : vector<4xf32> to vector<1x4xf32>
    %cst_11 = arith.constant dense<0xFF800000> : vector<1xf32>
    %14 = vector.multi_reduction <maximumf>, %13, %cst_11 [1] : vector<1x4xf32> to vector<1xf32>
    %15 = vector.shape_cast %14 : vector<1xf32> to vector<1x1xf32>
    %16 = vector.broadcast %15 : vector<1x1xf32> to vector<32x4xf32>
    %17 = arith.subf %11, %16 : vector<32x4xf32>
    %18 = math.exp %17 : vector<32x4xf32>
    %c0_12 = arith.constant 0 : index
    %c0_13 = arith.constant 0 : index
    %19 = vector.load %arg2[%c0_12, %c0_13] : memref<16x32xf32, #tpu.memory_space<vmem>>, vector<16x32xf32>
    %cst_14 = arith.constant dense<0.000000e+00> : vector<16x4xf32>
    %20 = tpu.matmul %19, %18, %cst_14 {dimension_numbers = #tpu.dot_dimension_numbers<[1], [0], [0], [1], [0, 0, 1, 1], [], []>} : vector<16x32xf32>, vector<32x4xf32>, vector<16x4xf32> -> vector<16x4xf32>
    %cst_15 = arith.constant 1.000000e-30 : f32
    %21 = vector.broadcast %cst_15 : f32 to vector<16x4xf32>
    %22 = arith.maximumf %20, %21 : vector<16x4xf32>
    %cst_16 = arith.constant 1.000000e+00 : f32
    %23 = vector.broadcast %cst_16 : f32 to vector<16x4xf32>
    %24 = arith.divf %23, %22 : vector<16x4xf32>
    %25 = vector.extract_strided_slice %18 {offsets = [0, 0], sizes = [32, 1], strides = [1, 1]} : vector<32x4xf32> to vector<32x1xf32>
    %26 = vector.broadcast %25 : vector<32x1xf32> to vector<32x64xf32>
    %27 = arith.mulf %26, %0 : vector<32x64xf32>
    %cst_17 = arith.constant dense<0.000000e+00> : vector<16x64xf32>
    %28 = tpu.matmul %19, %27, %cst_17 {dimension_numbers = #tpu.dot_dimension_numbers<[1], [0], [0], [1], [0, 0, 1, 1], [], []>} : vector<16x32xf32>, vector<32x64xf32>, vector<16x64xf32> -> vector<16x64xf32>
    %29 = vector.extract_strided_slice %24 {offsets = [0, 0], sizes = [16, 1], strides = [1, 1]} : vector<16x4xf32> to vector<16x1xf32>
    %30 = vector.broadcast %29 : vector<16x1xf32> to vector<16x64xf32>
    %31 = arith.mulf %28, %30 : vector<16x64xf32>
    %c0_18 = arith.constant 0 : index
    %c0_19 = arith.constant 0 : index
    %c0_20 = arith.constant 0 : index
    %32 = vector.load %arg6[%c0_18, %c0_19, %c0_20] : memref<4x16x64xf32, #tpu.memory_space<vmem>>, vector<1x16x64xf32>
    %33 = vector.shape_cast %32 : vector<1x16x64xf32> to vector<16x64xf32>
    %34 = vector.shape_cast %31 : vector<16x64xf32> to vector<1x16x64xf32>
    tpu.vector_store %arg6[%c0_18, %c0_19, %c0_20], %34 {strides = array<i32>} : memref<4x16x64xf32, #tpu.memory_space<vmem>>, vector<1x16x64xf32>,
    %35 = vector.extract_strided_slice %18 {offsets = [0, 1], sizes = [32, 1], strides = [1, 1]} : vector<32x4xf32> to vector<32x1xf32>
    %36 = vector.broadcast %35 : vector<32x1xf32> to vector<32x64xf32>
    %37 = arith.mulf %36, %0 : vector<32x64xf32>
    %cst_21 = arith.constant dense<0.000000e+00> : vector<16x64xf32>
    %38 = tpu.matmul %19, %37, %cst_21 {dimension_numbers = #tpu.dot_dimension_numbers<[1], [0], [0], [1], [0, 0, 1, 1], [], []>} : vector<16x32xf32>, vector<32x64xf32>, vector<16x64xf32> -> vector<16x64xf32>
    %39 = vector.extract_strided_slice %24 {offsets = [0, 1], sizes = [16, 1], strides = [1, 1]} : vector<16x4xf32> to vector<16x1xf32>
    %40 = vector.broadcast %39 : vector<16x1xf32> to vector<16x64xf32>
    %41 = arith.mulf %38, %40 : vector<16x64xf32>
    %c1 = arith.constant 1 : index
    %c0_22 = arith.constant 0 : index
    %c0_23 = arith.constant 0 : index
    %42 = vector.load %arg6[%c1, %c0_22, %c0_23] : memref<4x16x64xf32, #tpu.memory_space<vmem>>, vector<1x16x64xf32>
    %43 = vector.shape_cast %42 : vector<1x16x64xf32> to vector<16x64xf32>
    %44 = vector.shape_cast %41 : vector<16x64xf32> to vector<1x16x64xf32>
    tpu.vector_store %arg6[%c1, %c0_22, %c0_23], %44 {strides = array<i32>} : memref<4x16x64xf32, #tpu.memory_space<vmem>>, vector<1x16x64xf32>,
    %45 = vector.extract_strided_slice %18 {offsets = [0, 2], sizes = [32, 1], strides = [1, 1]} : vector<32x4xf32> to vector<32x1xf32>
    %46 = vector.broadcast %45 : vector<32x1xf32> to vector<32x64xf32>
    %47 = arith.mulf %46, %0 : vector<32x64xf32>
    %cst_24 = arith.constant dense<0.000000e+00> : vector<16x64xf32>
    %48 = tpu.matmul %19, %47, %cst_24 {dimension_numbers = #tpu.dot_dimension_numbers<[1], [0], [0], [1], [0, 0, 1, 1], [], []>} : vector<16x32xf32>, vector<32x64xf32>, vector<16x64xf32> -> vector<16x64xf32>
    %49 = vector.extract_strided_slice %24 {offsets = [0, 2], sizes = [16, 1], strides = [1, 1]} : vector<16x4xf32> to vector<16x1xf32>
    %50 = vector.broadcast %49 : vector<16x1xf32> to vector<16x64xf32>
    %51 = arith.mulf %48, %50 : vector<16x64xf32>
    %c2 = arith.constant 2 : index
    %c0_25 = arith.constant 0 : index
    %c0_26 = arith.constant 0 : index
    %52 = vector.load %arg6[%c2, %c0_25, %c0_26] : memref<4x16x64xf32, #tpu.memory_space<vmem>>, vector<1x16x64xf32>
    %53 = vector.shape_cast %52 : vector<1x16x64xf32> to vector<16x64xf32>
    %54 = vector.shape_cast %51 : vector<16x64xf32> to vector<1x16x64xf32>
    tpu.vector_store %arg6[%c2, %c0_25, %c0_26], %54 {strides = array<i32>} : memref<4x16x64xf32, #tpu.memory_space<vmem>>, vector<1x16x64xf32>,
    %55 = vector.extract_strided_slice %18 {offsets = [0, 3], sizes = [32, 1], strides = [1, 1]} : vector<32x4xf32> to vector<32x1xf32>
    %56 = vector.broadcast %55 : vector<32x1xf32> to vector<32x64xf32>
    %57 = arith.mulf %56, %0 : vector<32x64xf32>
    %cst_27 = arith.constant dense<0.000000e+00> : vector<16x64xf32>
    %58 = tpu.matmul %19, %57, %cst_27 {dimension_numbers = #tpu.dot_dimension_numbers<[1], [0], [0], [1], [0, 0, 1, 1], [], []>} : vector<16x32xf32>, vector<32x64xf32>, vector<16x64xf32> -> vector<16x64xf32>
    %59 = vector.extract_strided_slice %24 {offsets = [0, 3], sizes = [16, 1], strides = [1, 1]} : vector<16x4xf32> to vector<16x1xf32>
    %60 = vector.broadcast %59 : vector<16x1xf32> to vector<16x64xf32>
    %61 = arith.mulf %58, %60 : vector<16x64xf32>
    %c3 = arith.constant 3 : index
    %c0_28 = arith.constant 0 : index
    %c0_29 = arith.constant 0 : index
    %62 = vector.load %arg6[%c3, %c0_28, %c0_29] : memref<4x16x64xf32, #tpu.memory_space<vmem>>, vector<1x16x64xf32>
    %63 = vector.shape_cast %62 : vector<1x16x64xf32> to vector<16x64xf32>
    %64 = vector.shape_cast %61 : vector<16x64xf32> to vector<1x16x64xf32>
    tpu.vector_store %arg6[%c3, %c0_28, %c0_29], %64 {strides = array<i32>} : memref<4x16x64xf32, #tpu.memory_space<vmem>>, vector<1x16x64xf32>,
    return
  }
}

</mosaic_0001>

<bundles_post_ra>
// kernel: tpu_custom_call.1
= control target key start
LH: loop header
LB: loop body
LE: loop exit
PB: predicated region body
PF: predicated region fallthrough
CT: control target
= control target key end

     0   :  { %v1098_v4 = vmov 0.0   ;;  %s1412_s0 = inlined_call_operand.vmem [shape: f32[32,64], index: 0, kind: input, shape index: {}]   ;;  %s1413_s1 = inlined_call_operand.vmem [shape: f32[32,1], index: 1, kind: input, shape index: {}]   ;;  %s1414_s2 = inlined_call_operand.vmem [shape: f32[16,32], index: 2, kind: input, shape index: {}]   ;;  %s1415_s3 = inlined_call_operand.vmem [shape: f32[64,256], index: 3, kind: input, shape index: {}]   ;;  %s1416_s4 = inlined_call_operand.vmem [shape: f32[1,256], index: 4, kind: input, shape index: {}]   ;;  %s1417_s5 = inlined_call_operand.vmem [shape: f32[256,4], index: 5, kind: input, shape index: {}]   ;;  %s1418_s6 = inlined_call_operand.hbm [shape: f32[4,16,64], index: 6, kind: output, shape index: {}]  }
   0x1   :  { %v43_v0 = vld [vmem:[%s1415_s3 + $0x78] sm:$0xff]  ;;  %v42_v1 = vld [vmem:[%s1415_s3 + $0x70] sm:$0xff]  ;;  %v41_v2 = vld [vmem:[%s1415_s3 + $0x68] sm:$0xff]  ;;  %133 = vmatprep.mubr.f32.mxu0 %v1098_v4 }
   0x2   :  { %85 = vmatprep.subr.mxu0 %v43_v0  ;;  %v40_v3 = vld [vmem:[%s1415_s3 + $0x60] sm:$0xff]  ;;  %v39_v5 = vld [vmem:[%s1415_s3 + $0x58] sm:$0xff]  ;;  %v38_v6 = vld [vmem:[%s1415_s3 + $0x50] sm:$0xff] }
   0x3   :  { %86 = vmatpush1.msra.mxu0 %v42_v1  ;;  %v37_v7 = vld [vmem:[%s1415_s3 + $0x48] sm:$0xff]  ;;  %v36_v8 = vld [vmem:[%s1415_s3 + $0x40] sm:$0xff]  ;;  %v35_v9 = vld [vmem:[%s1415_s3 + $0x38] sm:$0xff] }
   0x4   :  { %87 = vmatprep.subr.mxu0 %v41_v2  ;;  %v34_v10 = vld [vmem:[%s1415_s3 + $0x30] sm:$0xff]  ;;  %v197_v11 = vld [vmem:[%s1417_s5 + $0xf8] sm:$0xff]  ;;  %v33_v15 = vld [vmem:[%s1415_s3 + $0x28] sm:$0xff] }
   0x5   :  { %88 = vmatpush1.msra.mxu0 %v40_v3  ;;  %893 = vmatprep.subr.mxu1 %v197_v11  ;;  %v181_v12 = vld [vmem:[%s1417_s5 + $0x78] sm:$0xff]  ;;  %v196_v13 = vld [vmem:[%s1417_s5 + $0xf0] sm:$0xff]  ;;  %v195_v16 = vld [vmem:[%s1417_s5 + $0xe8] sm:$0xff] }
   0x6   :  { %89 = vmatprep.subr.mxu0 %v39_v5  ;;  %v180_v14 = vld [vmem:[%s1417_s5 + $0x70] sm:$0xff]  ;;  %894 = vmatpush3.msra.mxu1 %v181_v12  ;;  %v32_v17 = vld [vmem:[%s1415_s3 + $0x20] sm:$0xff]  ;;  %v179_v18 = vld [vmem:[%s1417_s5 + $0x68] sm:$0xff] }
   0x7   :  { %90 = vmatpush1.msra.mxu0 %v38_v6  ;;  %895 = vmatprep.subr.mxu1 %v196_v13  ;;  %v31_v19 = vld [vmem:[%s1415_s3 + $0x18] sm:$0xff]  ;;  %v194_v20 = vld [vmem:[%s1417_s5 + $0xe0] sm:$0xff]  ;;  %v30_v21 = vld [vmem:[%s1415_s3 + $0x10] sm:$0xff] }
   0x8   :  { %91 = vmatprep.subr.mxu0 %v37_v7  ;;  %896 = vmatpush3.msra.mxu1 %v180_v14  ;;  %v178_v22 = vld [vmem:[%s1417_s5 + $0x60] sm:$0xff] }
   0x9   :  { %92 = vmatpush1.msra.mxu0 %v36_v8  ;;  %897 = vmatprep.subr.mxu1 %v195_v16 }
   0xa   :  { %93 = vmatprep.subr.mxu0 %v35_v9 }
   0xb   :  { %94 = vmatpush1.msra.mxu0 %v34_v10 }
   0xc   :  { %95 = vmatprep.subr.mxu0 %v33_v15 }
   0xd   :  { %11 = vsyncpa [#allocation3], 0  ;;  %96 = vmatpush1.msra.mxu0 %v32_v17  ;;  %v29_v23 = vld [vmem:[%s1415_s3 + $0x8] sm:$0xff]  ;;  %898 = vmatpush3.msra.mxu1 %v179_v18  ;;  %v193_v24 = vld [vmem:[%s1417_s5 + $0xd8] sm:$0xff]  ;;  %vm56_vm0 = vcmask 523264   ;;  %v1099_v55 = vmov 0   ;;  %v46_v58 = vlaneseq }
   0xe   :  { %97 = vmatprep.subr.mxu0 %v31_v19  ;;  %v28_v25 = vld [vmem:[%s1415_s3] sm:$0xff]  ;;  %899 = vmatprep.subr.mxu1 %v194_v20  ;;  %v177_v26 = vld [vmem:[%s1417_s5 + $0x58] sm:$0xff]  ;;  %v192_v28 = vld [vmem:[%s1417_s5 + $0xd0] sm:$0xff]  ;;  %vm307_vm1 = vcmask 31744   ;;  %vm338_vm2 = vcmask 261120  }
   0xf   :  { %98 = vmatpush1.msra.mxu0 %v30_v21  ;;  %v1223_v27 = vld [vmem:[%s1412_s0] sm:$0xff]  ;;  %900 = vmatpush3.msra.mxu1 %v178_v22  ;;  %v176_v29 = vld [vmem:[%s1417_s5 + $0x50] sm:$0xff]  ;;  %v1237_v30 = vld [vmem:[%s1412_s0 + $0x8] sm:$0xff]  ;;  %v47_v59 = vshrl.u32 %v46_v58, 7 }
  0x10   :  { %99 = vmatprep.subr.mxu0 %v29_v23  ;;  %901 = vmatprep.subr.mxu1 %v193_v24  ;;  %v1245_v31 = vld [vmem:[%s1412_s0 + $0x10] sm:$0xff]  ;;  %v1253_v32 = vld [vmem:[%s1412_s0 + $0x18] sm:$0xff]  ;;  %v191_v33 = vld [vmem:[%s1417_s5 + $0xc8] sm:$0xff] }
  0x11   :  { %100 = vmatpush1.msra.mxu0 %v28_v25  ;;  %902 = vmatpush3.msra.mxu1 %v177_v26  ;;  %v175_v34 = vld [vmem:[%s1417_s5 + $0x48] sm:$0xff]  ;;  %v190_v35 = vld [vmem:[%s1417_s5 + $0xc0] sm:$0xff]  ;;  %v189_v37 = vld [vmem:[%s1417_s5 + $0xb8] sm:$0xff]  ;;  %v48_v60 = vsub.s32 0, %v47_v59  ;;  %v52_v62 = vsub.s32 1, %v47_v59 }
  0x12   :  { %879 = vmatmul.mubr.msk.f32.vlgmr.msra.gmra.mxu0 %vm56_vm0, %v1223_v27  ;;  %903 = vmatprep.subr.mxu1 %v192_v28  ;;  %v174_v36 = vld [vmem:[%s1417_s5 + $0x40] sm:$0xff]  ;;  %v173_v38 = vld [vmem:[%s1417_s5 + $0x38] sm:$0xff]  ;;  %v188_v39 = vld [vmem:[%s1417_s5 + $0xb0] sm:$0xff] }
  0x13   :  { %139 = vmatprep.mubr.f32.mxu0 %v1098_v4  ;;  %904 = vmatpush3.msra.mxu1 %v176_v29  ;;  %v172_v40 = vld [vmem:[%s1417_s5 + $0x30] sm:$0xff]  ;;  %v187_v41 = vld [vmem:[%s1417_s5 + $0xa8] sm:$0xff]  ;;  %v186_v43 = vld [vmem:[%s1417_s5 + $0xa0] sm:$0xff] }
  0x14   :  { %905 = vmatprep.subr.mxu1 %v191_v33  ;;  %v171_v42 = vld [vmem:[%s1417_s5 + $0x28] sm:$0xff]  ;;  %v170_v44 = vld [vmem:[%s1417_s5 + $0x20] sm:$0xff]  ;;  %v185_v45 = vld [vmem:[%s1417_s5 + $0x98] sm:$0xff]  ;;  %1030 = vset.pattern.permute.xlu0 %v1099_v55 }
  0x15   :  { %906 = vmatpush3.msra.mxu1 %v175_v34  ;;  %v169_v46 = vld [vmem:[%s1417_s5 + $0x18] sm:$0xff]  ;;  %v184_v47 = vld [vmem:[%s1417_s5 + $0x90] sm:$0xff]  ;;  %v183_v49 = vld [vmem:[%s1417_s5 + $0x88] sm:$0xff]  ;;  %1031 = vset.pattern.permute.xlu1 %v1099_v55 }
  0x16   :  { %880 = vmatmul.mubr.msk.f32.gmra.mxu0 %vm56_vm0, %v1237_v30  ;;  %907 = vmatprep.subr.mxu1 %v190_v35  ;;  %v168_v48 = vld [vmem:[%s1417_s5 + $0x10] sm:$0xff]  ;;  %v167_v50 = vld [vmem:[%s1417_s5 + $0x8] sm:$0xff]  ;;  %v182_v51 = vld [vmem:[%s1417_s5 + $0x80] sm:$0xff] }
  0x17   :  { %145 = vmatprep.mubr.f32.mxu0 %v1098_v4  ;;  %908 = vmatpush3.msra.mxu1 %v174_v36  ;;  %v166_v52 = vld [vmem:[%s1417_s5] sm:$0xff]  ;;  %v200_v54 = vld [vmem:[%s1413_s1 + $0x10] sm:$0xff]  ;;  %v199_v56 = vld [vmem:[%s1413_s1 + $0x8] sm:$0xff] }
  0x18   :  { %909 = vmatprep.subr.mxu1 %v189_v37  ;;  %v198_v53 = vld [vmem:[%s1413_s1] sm:$0xff]  ;;  %214 = vperm.xlu1 %1031, %v200_v54   ;;  %v201_v57 = vld [vmem:[%s1413_s1 + $0x18] sm:$0xff] }
  0x19   :  { %910 = vmatpush3.msra.mxu1 %v173_v38  ;;  %204 = vperm.xlu0 %1030, %v198_v53   ;;  %v44_v61 = vld [vmem:[%s1416_s4] sm:$0x3] }
  0x1a   :  { %881 = vmatmul.mubr.msk.f32.gmra.mxu0 %vm56_vm0, %v1245_v31  ;;  %911 = vmatprep.subr.mxu1 %v188_v39  ;;  %v49_v63 = vrot.slane %v44_v61, %v48_v60  ;;  %v53_v0 = vrot.slane %v44_v61, %v52_v62 }
  0x1b   :  { %151 = vmatprep.mubr.f32.mxu0 %v1098_v4  ;;  %912 = vmatpush3.msra.mxu1 %v172_v40 }
  0x1c   :  { %913 = vmatprep.subr.mxu1 %v187_v41  ;;  %219 = vperm.xlu1 %1031, %v201_v57  }
  0x1d   :  { %914 = vmatpush3.msra.mxu1 %v171_v42  ;;  %209 = vperm.xlu0 %1030, %v199_v56  }
  0x1e   :  { %882 = vmatmul.mubr.msk.f32.gmra.mxu0 %vm56_vm0, %v1253_v32  ;;  %915 = vmatprep.subr.mxu1 %v186_v43 }
  0x1f   :  { %916 = vmatpush3.msra.mxu1 %v170_v44 }
  0x20   :  { %917 = vmatprep.subr.mxu1 %v185_v45 }
  0x21   :  { %918 = vmatpush3.msra.mxu1 %v169_v46 }
  0x22   :  { %919 = vmatprep.subr.mxu1 %v184_v47 }
  0x23   :  { %920 = vmatpush3.msra.mxu1 %v168_v48 }
  0x24   :  { %921 = vmatprep.subr.mxu1 %v183_v49 }
  0x25   :  { %922 = vmatpush3.msra.mxu1 %v167_v50 }
  0x26   :  { %923 = vmatprep.subr.mxu1 %v182_v51 }
  0x27   :  { %924 = vmatpush3.msra.mxu1 %v166_v52 }
  0x93   :  { %v215_v36 = vpop.permute.xlu1 %214 }
  0x94   :  { %v205_v28 = vpop.permute.xlu0 %204 }
  0x97   :  { %v220_v47 = vpop.permute.xlu1 %219 }
  0x98   :  { %v210_v37 = vpop.permute.xlu0 %209 }
  0xd2   :  { %v135_v1 = vpop.f32.mrf.mxu0 }
  0xd3   :  { %v136_v2 = vadd.f32 %v135_v1, %v49_v63  ;;  %v1343_v1 = vld [vmem:[%s1414_s2] sm:$0xff] }
  0xd4   :  { %v137_v3 = vpop.f32.mrf.mxu0  ;;  %975 = vmatprep.mubr.msk.f32.mxu0 %vm338_vm2, %v1343_v1 }
  0xd5   :  { %v138_v4 = vadd.f32 %v137_v3, %v53_v0 }
  0xd6   :  { %v141_v5 = vpop.f32.mrf.mxu0 }
  0xd7   :  { %1048 = vtanh.f32 %v138_v4  ;;  %v142_v6 = vadd.f32 %v141_v5, %v49_v63 }
  0xd8   :  { %1050 = vtanh.f32 %v136_v2  ;;  %v143_v7 = vpop.f32.mrf.mxu0 }
  0xd9   :  { %v144_v8 = vadd.f32 %v143_v7, %v53_v0 }
  0xda   :  { %v147_v9 = vpop.f32.mrf.mxu0 }
  0xdb   :  { %1052 = vtanh.f32 %v144_v8  ;;  %v148_v10 = vadd.f32 %v147_v9, %v49_v63 }
  0xdc   :  { %1054 = vtanh.f32 %v142_v6  ;;  %v149_v11 = vpop.f32.mrf.mxu0 }
  0xdd   :  { %v150_v12 = vadd.f32 %v149_v11, %v53_v0 }
  0xde   :  { %v153_v13 = vpop.f32.mrf.mxu0 }
  0xdf   :  { %1056 = vtanh.f32 %v150_v12  ;;  %v154_v14 = vadd.f32 %v153_v13, %v49_v63 }
  0xe0   :  { %1058 = vtanh.f32 %v148_v10  ;;  %v155_v15 = vpop.f32.mrf.mxu0 }
  0xe1   :  { %v156_v16 = vadd.f32 %v155_v15, %v53_v0  ;;  %v1100_v0 = vmov 2   ;;  %v1352_v15 = vld [vmem:[%s1414_s2 + $0x8] sm:$0xff]  ;;  %s1103_s2 = smov [#allocation2]  }
  0xe2   :  { %1033 = vset.pattern.permute.xlu0 %v1100_v0  ;;  %s868_s11 = sshll.u32 %s1103_s2, 4  ;;  %s869_s11 = int_to_ptr.vmem [resolvable:$true] %s868_s11 }
  0xe3   :  { %1060 = vtanh.f32 %v156_v16  ;;  %v1101_v16 = vmov 1   ;;  %s1076_s12 = scalar_lea.vmem %s869_s11, 1024  ;;  %p1081_p1 = scmp.lt.s32.totalorder %s869_s11, %s869_s11 }
  0xe4   :  { %v1049_v17 = vpop.eup %1048  ;;  %1062 = vtanh.f32 %v154_v14  ;;  %p1077_p0 = scmp.ne.s32.totalorder %s869_s11, %s1076_s12  ;;  %p1082_p2 = scmp.lt.s32.totalorder %s1076_s12, %s1076_s12 }
  0xe5   :  { %v1051_v18 = vpop.eup %1050  ;;  %286 = vmatprep.mubr.f32.mxu1 %v1049_v17  ;;  %v1102_v17 = vmov 3  }
  0xe6   :  { %287 = vmatmul.mubr.f32.vlgmr.msra.gmra.mxu1 %v1051_v18  ;;  %p1083_p3 = por %p1082_p2, %p1081_p1 }
  0xe8   :  { %v1053_v19 = vpop.eup %1052  ;;  %p1084_p4 = pnand %p1083_p3, %p1077_p0 }
  0xe9   :  { %v1055_v20 = vpop.eup %1054  ;;  %291 = vmatprep.mubr.f32.mxu1 %v1053_v19 }
  0xea   :  { %292 = vmatmul.mubr.f32.gmra.mxu1 %v1055_v20 }
  0xec   :  { %v1057_v21 = vpop.eup %1056 }
  0xed   :  { %v1059_v22 = vpop.eup %1058  ;;  %296 = vmatprep.mubr.f32.mxu1 %v1057_v21 }
  0xee   :  { %297 = vmatmul.mubr.f32.gmra.mxu1 %v1059_v22 }
  0xf0   :  { %v1061_v23 = vpop.eup %1060 }
  0xf1   :  { %v1063_v24 = vpop.eup %1062  ;;  %301 = vmatprep.mubr.f32.mxu1 %v1061_v23 }
  0xf2   :  { %302 = vmatmul.mubr.f32.gmra.mxu1 %v1063_v24 }
  0xf3   :  { %1008 = vmatprep.mubr.msk.f32.mxu1 %vm338_vm2, %v1343_v1 }
 0x1a6   :  { %v925_v25 = vpop.f32.mrf.mxu1 }
 0x1a8   :  { %v926_v26 = vpop.f32.mrf.mxu1 }
 0x1a9   :  { %v927_v39 = vadd.f32 %v926_v26, %v925_v25 }
 0x1aa   :  { %v928_v29 = vpop.f32.mrf.mxu1 }
 0x1ab   :  { %v289_v44 = vadd.f32 %v927_v39, %v205_v28 }
 0x1ac   :  { %v929_v33 = vpop.f32.mrf.mxu1 }
 0x1ad   :  { %v930_v35 = vadd.f32 %v929_v33, %v928_v29  ;;  %v308_v50 = vsel %vm307_vm1, %v289_v44, -inf }
 0x1ae   :  { %v931_v34 = vpop.f32.mrf.mxu1 }
 0x1af   :  { %v294_v42 = vadd.f32 %v930_v35, %v210_v37 }
 0x1b0   :  { %v932_v38 = vpop.f32.mrf.mxu1 }
 0x1b1   :  { %v933_v40 = vadd.f32 %v932_v38, %v931_v34  ;;  %v309_v48 = vsel %vm307_vm1, %v294_v42, -inf }
 0x1b2   :  { %v934_v41 = vpop.f32.mrf.mxu1  ;;  %v312_v53 = vmax.f32 %v308_v50, %v309_v48 }
 0x1b3   :  { %v299_v45 = vadd.f32 %v933_v40, %v215_v36 }
 0x1b4   :  { %v935_v43 = vpop.f32.mrf.mxu1 }
 0x1b5   :  { %v936_v46 = vadd.f32 %v935_v43, %v934_v41  ;;  %v310_v51 = vsel %vm307_vm1, %v299_v45, -inf }
 0x1b7   :  { %v304_v49 = vadd.f32 %v936_v46, %v220_v47 }
 0x1b9   :  { %v311_v52 = vsel %vm307_vm1, %v304_v49, -inf }
 0x1ba   :  { %v313_v54 = vmax.f32 %v310_v51, %v311_v52 }
 0x1bc   :  { %v314_v56 = vmax.f32 %v312_v53, %v313_v54 }
 0x1be   :  { %v315_v57 = vrot.slane %v314_v56, 4 }
 0x1c0   :  { %v316_v58 = vmax.f32 %v314_v56, %v315_v57 }
 0x1c2   :  { %v317_v59 = vrot.slane %v316_v58, 2 }
 0x1c4   :  { %v318_v60 = vmax.f32 %v316_v58, %v317_v59 }
 0x1c6   :  { %v319_v61 = vrot.slane %v318_v60, 1 }
 0x1c8   :  { %v320_v62 = vmax.f32 %v318_v60, %v319_v61 }
 0x1ca   :  { %v321_v63 = vsel %vm307_vm1, %v320_v62, -inf }
 0x1cb   :  { %322 = vmax.xlane.f32.xlu0 %v321_v63 }
 0x254   :  { %v323_v2 = vpop.xlane.xlu0 %322 }
 0x255   :  { %v327_v3 = vsub.f32 %v304_v49, %v323_v2  ;;  %v326_v4 = vsub.f32 %v299_v45, %v323_v2  ;;  %v325_v6 = vsub.f32 %v294_v42, %v323_v2  ;;  %v324_v7 = vsub.f32 %v289_v44, %v323_v2 }
 0x257   :  { %v334_v5 = vmul.f32 1.442695, %v327_v3  ;;  %v332_v8 = vmul.f32 1.442695, %v326_v4  ;;  %v330_v9 = vmul.f32 1.442695, %v325_v6 }
 0x258   :  { %v328_v10 = vmul.f32 1.442695, %v324_v7 }
 0x259   :  { %1064 = vpow2.f32 %v334_v5 }
 0x25a   :  { %1066 = vpow2.f32 %v332_v8 }
 0x25b   :  { %1068 = vpow2.f32 %v330_v9 }
 0x25c   :  { %1070 = vpow2.f32 %v328_v10 }
 0x266   :  { %v1065_v11 = vpop.eup %1064 }
 0x267   :  { %660 = vperm.xlu0 %1033, %v1065_v11   ;;  %443 = vperm.xlu1 %1031, %v1065_v11   ;;  %v1067_v12 = vpop.eup %1066 }
 0x268   :  { %967 = vmatprep.subr.mxu0 %v1065_v11  ;;  %v1069_v13 = vpop.eup %1068 }
 0x269   :  { %968 = vmatpush3.msra.mxu0 %v1065_v11  ;;  %v1071_v14 = vpop.eup %1070 }
 0x26a   :  { %969 = vmatprep.subr.mxu0 %v1067_v12 }
 0x26b   :  { %970 = vmatpush3.msra.mxu0 %v1067_v12  ;;  %438 = vperm.xlu1 %1031, %v1067_v12  }
 0x26c   :  { %971 = vmatprep.subr.mxu0 %v1069_v13 }
 0x26d   :  { %972 = vmatpush3.msra.mxu0 %v1069_v13 }
 0x26e   :  { %973 = vmatprep.subr.mxu0 %v1071_v14 }
 0x26f   :  { %974 = vmatpush3.msra.mxu0 %v1071_v14  ;;  %433 = vperm.xlu1 %1031, %v1069_v13  }
 0x270   :  { %976 = vmatmul.mubr.msk.f32.vlgmr.msra.gmra.mxu0 %vm338_vm2, %v1352_v15 }
 0x271   :  { %986 = vmatprep.mubr.msk.f32.mxu0 %vm338_vm2, %v1343_v1 }
 0x273   :  { %428 = vperm.xlu1 %1031, %v1071_v14  }
 0x277   :  { %1032 = vset.pattern.permute.xlu1 %v1101_v16 }
 0x278   :  { %552 = vperm.xlu1 %1032, %v1065_v11  }
 0x27c   :  { %548 = vperm.xlu1 %1032, %v1067_v12  }
 0x280   :  { %544 = vperm.xlu1 %1032, %v1069_v13  }
 0x284   :  { %540 = vperm.xlu1 %1032, %v1071_v14  }
 0x288   :  { %1034 = vset.pattern.permute.xlu1 %v1102_v17 }
 0x289   :  { %768 = vperm.xlu1 %1034, %v1065_v11  }
 0x28d   :  { %1035 = vset.pattern.permute.xlu1 %v1100_v0 }
 0x28e   :  { %656 = vperm.xlu1 %1035, %v1067_v12  }
 0x292   :  { %1036 = vset.pattern.permute.xlu1 %v1102_v17 }
 0x293   :  { %764 = vperm.xlu1 %1036, %v1067_v12  }
 0x297   :  { %1037 = vset.pattern.permute.xlu1 %v1100_v0 }
 0x298   :  { %652 = vperm.xlu1 %1037, %v1069_v13  }
 0x29c   :  { %1038 = vset.pattern.permute.xlu1 %v1102_v17 }
 0x29d   :  { %760 = vperm.xlu1 %1038, %v1069_v13  }
 0x2a1   :  { %1039 = vset.pattern.permute.xlu1 %v1100_v0 }
 0x2a2   :  { %648 = vperm.xlu1 %1039, %v1071_v14  }
 0x2a6   :  { %1040 = vset.pattern.permute.xlu1 %v1102_v17 }
 0x2a7   :  { %756 = vperm.xlu1 %1040, %v1071_v14  }
 0x2ab   :  { %1041 = vset.pattern.permute.xlu1 %v1099_v55 }
 0x2e2   :  { %v661_v18 = vpop.permute.xlu0 %660  ;;  %v444_v19 = vpop.permute.xlu1 %443 }
 0x2e3   :  { %v666_v20 = vmul.f32 %v661_v18, %v1253_v32  ;;  %v449_v21 = vmul.f32 %v444_v19, %v1253_v32 }
 0x2e5   :  { %978 = vmatprep.subr.mxu0 %v449_v21  ;;  %1000 = vmatprep.subr.mxu1 %v666_v20 }
 0x2e6   :  { %1001 = vmatpush3.msra.mxu1 %v666_v20  ;;  %v439_v22 = vpop.permute.xlu1 %438  ;;  %979 = vmatpush3.msra.mxu0 %v449_v21 }
 0x2e7   :  { %v448_v23 = vmul.f32 %v439_v22, %v1245_v31 }
 0x2e9   :  { %980 = vmatprep.subr.mxu0 %v448_v23 }
 0x2ea   :  { %v434_v24 = vpop.permute.xlu1 %433  ;;  %981 = vmatpush3.msra.mxu0 %v448_v23 }
 0x2eb   :  { %v447_v25 = vmul.f32 %v434_v24, %v1237_v30 }
 0x2ed   :  { %982 = vmatprep.subr.mxu0 %v447_v25 }
 0x2ee   :  { %v429_v26 = vpop.permute.xlu1 %428  ;;  %983 = vmatpush3.msra.mxu0 %v447_v25 }
 0x2ef   :  { %v446_v28 = vmul.f32 %v429_v26, %v1223_v27 }
 0x2f1   :  { %984 = vmatprep.subr.mxu0 %v446_v28 }
 0x2f2   :  { %985 = vmatpush3.msra.mxu0 %v446_v28 }
 0x2f3   :  { %v553_v29 = vpop.permute.xlu1 %552  ;;  %987 = vmatmul.mubr.msk.f32.vlgmr.msra.gmra.mxu0 %vm338_vm2, %v1352_v15 }
 0x2f4   :  { %v558_v33 = vmul.f32 %v553_v29, %v1253_v32  ;;  %997 = vmatprep.mubr.msk.f32.mxu0 %vm338_vm2, %v1343_v1 }
 0x2f6   :  { %989 = vmatprep.subr.mxu0 %v558_v33 }
 0x2f7   :  { %v549_v34 = vpop.permute.xlu1 %548  ;;  %990 = vmatpush3.msra.mxu0 %v558_v33 }
 0x2f8   :  { %v557_v35 = vmul.f32 %v549_v34, %v1245_v31 }
 0x2fa   :  { %991 = vmatprep.subr.mxu0 %v557_v35 }
 0x2fb   :  { %v545_v36 = vpop.permute.xlu1 %544  ;;  %992 = vmatpush3.msra.mxu0 %v557_v35 }
 0x2fc   :  { %v556_v37 = vmul.f32 %v545_v36, %v1237_v30 }
 0x2fe   :  { %993 = vmatprep.subr.mxu0 %v556_v37 }
 0x2ff   :  { %v541_v38 = vpop.permute.xlu1 %540  ;;  %994 = vmatpush3.msra.mxu0 %v556_v37 }
 0x300   :  { %v555_v39 = vmul.f32 %v541_v38, %v1223_v27 }
 0x302   :  { %995 = vmatprep.subr.mxu0 %v555_v39 }
 0x303   :  { %996 = vmatpush3.msra.mxu0 %v555_v39 }
 0x304   :  { %v769_v40 = vpop.permute.xlu1 %768  ;;  %998 = vmatmul.mubr.msk.f32.vlgmr.msra.gmra.mxu0 %vm338_vm2, %v1352_v15 }
 0x305   :  { %v774_v41 = vmul.f32 %v769_v40, %v1253_v32  ;;  %1019 = vmatprep.mubr.msk.f32.mxu0 %vm338_vm2, %v1343_v1 }
 0x307   :  { %1011 = vmatprep.subr.mxu0 %v774_v41 }
 0x308   :  { %1012 = vmatpush3.msra.mxu0 %v774_v41 }
 0x309   :  { %v657_v42 = vpop.permute.xlu1 %656 }
 0x30a   :  { %v665_v43 = vmul.f32 %v657_v42, %v1245_v31 }
 0x30c   :  { %1002 = vmatprep.subr.mxu1 %v665_v43 }
 0x30d   :  { %1003 = vmatpush3.msra.mxu1 %v665_v43 }
 0x30e   :  { %v765_v44 = vpop.permute.xlu1 %764 }
 0x30f   :  { %v773_v45 = vmul.f32 %v765_v44, %v1245_v31 }
 0x311   :  { %1013 = vmatprep.subr.mxu0 %v773_v45 }
 0x312   :  { %1014 = vmatpush3.msra.mxu0 %v773_v45 }
 0x313   :  { %v653_v46 = vpop.permute.xlu1 %652 }
 0x314   :  { %v664_v47 = vmul.f32 %v653_v46, %v1237_v30 }
 0x316   :  { %1004 = vmatprep.subr.mxu1 %v664_v47 }
 0x317   :  { %1005 = vmatpush3.msra.mxu1 %v664_v47 }
 0x318   :  { %v761_v32 = vpop.permute.xlu1 %760 }
 0x319   :  { %v772_v48 = vmul.f32 %v761_v32, %v1237_v30 }
 0x31b   :  { %1015 = vmatprep.subr.mxu0 %v772_v48 }
 0x31c   :  { %1016 = vmatpush3.msra.mxu0 %v772_v48 }
 0x31d   :  { %v649_v49 = vpop.permute.xlu1 %648 }
 0x31e   :  { %v663_v50 = vmul.f32 %v649_v49, %v1223_v27 }
 0x320   :  { %1006 = vmatprep.subr.mxu1 %v663_v50 }
 0x321   :  { %1007 = vmatpush3.msra.mxu1 %v663_v50 }
 0x322   :  { %1009 = vmatmul.mubr.msk.f32.vlgmr.msra.gmra.mxu1 %vm338_vm2, %v1352_v15  ;;  %v757_v31 = vpop.permute.xlu1 %756 }
 0x323   :  { %v771_v51 = vmul.f32 %v757_v31, %v1223_v27 }
 0x325   :  { %1017 = vmatprep.subr.mxu0 %v771_v51 }
 0x326   :  { %1018 = vmatpush3.msra.mxu0 %v771_v51 }
 0x327   :  { %1020 = vmatmul.mubr.msk.f32.vlgmr.msra.gmra.mxu0 %vm338_vm2, %v1352_v15 }
 0x330   :  { %v977_v52 = vpop.f32.mrf.mxu0 }
 0x331   :  { %v421_v30 = vmax.f32 %v977_v52, 1e-30 }
 0x332   :  { %v411_v53 = vpop.f32.mrf.mxu0 }
 0x333   :  { %1072 = vrcp.f32 %v421_v30  ;;  %v420_v54 = vmax.f32 %v411_v53, 1e-30 }
 0x335   :  { %1074 = vrcp.f32 %v420_v54 }
 0x340   :  { %v1073_v56 = vpop.eup %1072 }
 0x341   :  { %532 = vperm.xlu1 %1041, %v1073_v56  }
 0x342   :  { %v1075_v57 = vpop.eup %1074 }
 0x343   :  { %743 = vperm.xlu0 %1033, %v1075_v57  }
 0x345   :  { %1042 = vset.pattern.permute.xlu1 %v1101_v16 }
 0x346   :  { %639 = vperm.xlu1 %1042, %v1073_v56  }
 0x347   :  { %1046 = vset.pattern.permute.xlu0 %v1102_v17 }
 0x348   :  { %851 = vperm.xlu0 %1046, %v1075_v57  }
 0x34a   :  { %1043 = vset.pattern.permute.xlu1 %v1100_v0 }
 0x34b   :  { %747 = vperm.xlu1 %1043, %v1073_v56  }
 0x34f   :  { %1044 = vset.pattern.permute.xlu1 %v1099_v55 }
 0x350   :  { %527 = vperm.xlu1 %1044, %v1075_v57  }
 0x354   :  { %1045 = vset.pattern.permute.xlu1 %v1101_v16 }
 0x355   :  { %635 = vperm.xlu1 %1045, %v1075_v57  }
 0x359   :  { %1047 = vset.pattern.permute.xlu1 %v1102_v17 }
 0x35a   :  { %855 = vperm.xlu1 %1047, %v1073_v56  }
 0x3b3   :  { %v988_v58 = vpop.f32.mrf.mxu0 }
 0x3b5   :  { %v516_v60 = vpop.f32.mrf.mxu0 }
 0x3bc   :  { %v533_v27 = vpop.permute.xlu1 %532 }
 0x3bd   :  { %v536_v59 = vmul.f32 %v988_v58, %v533_v27 }
 0x3be   :  { %v744_v7 = vpop.permute.xlu0 %743 }
 0x3bf   :  { %538 = vst.msk [vmem:[#allocation2 + $0x8] sm:$0xff] %vm56_vm0, %v536_v59 }
 0x3c1   :  { %v640_v61 = vpop.permute.xlu1 %639 }
 0x3c3   :  { %v852_v13 = vpop.permute.xlu0 %851 }
 0x3c4   :  { %v999_v62 = vpop.f32.mrf.mxu0 }
 0x3c5   :  { %v643_v63 = vmul.f32 %v999_v62, %v640_v61 }
 0x3c6   :  { %v748_v0 = vpop.permute.xlu1 %747  ;;  %v625_v2 = vpop.f32.mrf.mxu0 }
 0x3c7   :  { %646 = vst.msk [vmem:[#allocation2 + $0x18] sm:$0xff] %vm56_vm0, %v643_v63 }
 0x3cb   :  { %v528_v55 = vpop.permute.xlu1 %527 }
 0x3cc   :  { %v535_v1 = vmul.f32 %v528_v55, %v516_v60 }
 0x3ce   :  { %537 = vst.msk [vmem:[#allocation2] sm:$0xff] %vm56_vm0, %v535_v1 }
 0x3d0   :  { %v636_v3 = vpop.permute.xlu1 %635 }
 0x3d1   :  { %v642_v4 = vmul.f32 %v636_v3, %v625_v2 }
 0x3d3   :  { %645 = vst.msk [vmem:[#allocation2 + $0x10] sm:$0xff] %vm56_vm0, %v642_v4 }
 0x3d5   :  { %v856_v10 = vpop.permute.xlu1 %855 }
 0x3e2   :  { %v1010_v5 = vpop.f32.mrf.mxu1 }
 0x3e3   :  { %v751_v6 = vmul.f32 %v1010_v5, %v748_v0 }
 0x3e4   :  { %v733_v8 = vpop.f32.mrf.mxu1 }
 0x3e5   :  { %754 = vst.msk [vmem:[#allocation2 + $0x28] sm:$0xff] %vm56_vm0, %v751_v6  ;;  %v750_v9 = vmul.f32 %v744_v7, %v733_v8 }
 0x3e7   :  { %753 = vst.msk [vmem:[#allocation2 + $0x20] sm:$0xff] %vm56_vm0, %v750_v9  ;;  %v1021_v11 = vpop.f32.mrf.mxu0 }
 0x3e8   :  { %v859_v12 = vmul.f32 %v1021_v11, %v856_v10 }
 0x3e9   :  { %v841_v14 = vpop.f32.mrf.mxu0 }
 0x3ea   :  { %862 = vst.msk [vmem:[#allocation2 + $0x38] sm:$0xff] %vm56_vm0, %v859_v12  ;;  %v858_v15 = vmul.f32 %v852_v13, %v841_v14 }
 0x3ec   :  { %861 = vst.msk [vmem:[#allocation2 + $0x30] sm:$0xff] %vm56_vm0, %v858_v15 }
 0x3ed   :  { %1087 = shalt.err (!%p1084_p4)
}
 0x3ee   :  { %s1104_s13 = smov 128   ;;  %s1105_s14 = smov 8  }
 0x3ef   :  { %874 = dma.vmem_to_hbm [thread:$0]  %s869_s11, 1024, %s1418_s6, [#allocation3], %s1104_s13, %s1104_s13, %s1105_s14  }
 0x3f0   :  { %1096 = dma.done.wait [#allocation3], 1024  }
 0x3f1   :  { %1097 = vsyncadd [#allocation3], 4294966272 }
 0x3f2   :  { %878 = vsyncpa [#allocation3], 1 }

</bundles_post_ra>
